<compile_context>
chip_gen: v5e
topology: v5e:2x2
jax: 0.10.0
libtpu: 0.0.40
codegen_flags: <defaults>
</compile_context>

<pallas_src>
import math

import jax
import jax.numpy as jnp
from jax import lax
from jax.experimental import pallas as pl
from jax.experimental.pallas import tpu as pltpu  # noqa: F401  (TPU-specific tuning hooks)

D_MODEL = 32
NHEAD = 4
DIM_FF = 32          # must equal D_MODEL for the hfta module's forward to be well-typed
HEAD_DIM = D_MODEL // NHEAD
LN_EPS = 1e-5
NEG_INF = -1e30


def _layernorm(x, w, b):
    mu = jnp.mean(x, axis=-1, keepdims=True)
    var = jnp.mean((x - mu) ** 2, axis=-1, keepdims=True)
    return (x - mu) * lax.rsqrt(var + LN_EPS) * w + b


def _encoder_layer_kernel(x_ref,                   # (M, E) f32, M = L*N fused tokens
                          bias_ref,                # (M, M) f32 block-diag attn bias (0 / -1e30)
                          wqkv_ref, bqkv_ref,      # (E, 3E) f32 (q cols pre-scaled), (1, 3E) f32
                          wo_ref, bo_ref,          # (E, E) f32, (1, E) f32
                          ln1_w_ref, ln1_b_ref,    # (1, E), (1, E) f32
                          w1_ref, b1_ref,          # (E, DFF) f32, (1, DFF) f32
                          w2_ref, b2_ref,          # (DFF, E) f32, (1, E) f32
                          ln2_w_ref, ln2_b_ref,    # (1, E), (1, E) f32
                          out_ref):                # (M, E) f32
    E = D_MODEL
    x = x_ref[...]                                  # (M, E) f32

    # ---- fused QKV projection over all N*L tokens (batch folded into M) ----
    qkv = jnp.dot(x, wqkv_ref[...], preferred_element_type=jnp.float32) + bqkv_ref[...]

    bias = bias_ref[...]                            # (M, M): 0 same-batch, -1e30 cross-batch
    wo = wo_ref[...]                                # (E, E)

    # ---- multi-head self attention; accumulate each head through its Wo rows ----
    attn = jnp.zeros(x.shape, jnp.float32)
    for h in range(NHEAD):                          # static unroll, no concat
        lo = h * HEAD_DIM
        hi = lo + HEAD_DIM
        qh = qkv[:, 0 * E + lo:0 * E + hi]          # (M, Hd), query scale already folded in
        kh = qkv[:, 1 * E + lo:1 * E + hi]
        vh = qkv[:, 2 * E + lo:2 * E + hi]

        # scores over all fused tokens; cross-batch pairs masked by the additive bias
        s = lax.dot_general(qh, kh, (((1,), (1,)), ((), ())),
                            preferred_element_type=jnp.float32) + bias     # (M, M)
        s = s - jnp.max(s, axis=-1, keepdims=True)
        p = jnp.exp(s)
        p = p / jnp.sum(p, axis=-1, keepdims=True)                         # exact softmax

        oh = jnp.dot(p, vh, preferred_element_type=jnp.float32)            # (M, Hd)
        attn = attn + jnp.dot(oh, wo[lo:hi, :],
                              preferred_element_type=jnp.float32)          # (M, E)
    attn = attn + bo_ref[...]

    # ---- residual + norm1 (f32) ----
    x1 = _layernorm(x + attn, ln1_w_ref[...], ln1_b_ref[...])

    # ---- feed forward (residual from linear1's output, per the hfta module) ----
    h1 = jnp.dot(x1, w1_ref[...], preferred_element_type=jnp.float32) + b1_ref[...]
    ff = jnp.dot(jnp.maximum(h1, 0.0), w2_ref[...],
                 preferred_element_type=jnp.float32) + b2_ref[...]
    y = h1 + ff

    # ---- norm2 ----
    out_ref[...] = _layernorm(y, ln2_w_ref[...], ln2_b_ref[...])


@jax.jit
def transformer_encoder_layer(src_lne, p):
    """src_lne: (L, N, E) float32, PyTorch MultiheadAttention convention. Returns (L, N, E)."""
    L, N, E = src_lne.shape
    M = L * N
    # Free contiguous reshape (no HBM transpose): rows ordered (l major, n minor).
    x2d = src_lne.reshape(M, E)

    # Block-diagonal attention bias: fused-token row i belongs to batch (i % N).
    bid = jnp.arange(M, dtype=jnp.int32) % N
    attn_bias = jnp.where(bid[:, None] == bid[None, :], 0.0, NEG_INF).astype(jnp.float32)

    # Fold the 1/sqrt(head_dim) query scale into the QKV weight/bias (host side, free).
    scale = 1.0 / math.sqrt(HEAD_DIM)
    qscale = jnp.concatenate([jnp.full((E,), scale, jnp.float32),
                              jnp.ones((2 * E,), jnp.float32)])

    kparams = (
        (p['wqkv'].T * qscale[None, :]).astype(jnp.float32),    # (E, 3E)
        (p['bqkv'] * qscale)[None, :],                          # (1, 3E)
        p['wo'].T.astype(jnp.float32), p['bo'][None, :],        # (E, E), (1, E)
        p['ln1_w'][None, :], p['ln1_b'][None, :],
        p['w1'].T.astype(jnp.float32), p['b1'][None, :],        # (E, DFF), (1, DFF)
        p['w2'].T.astype(jnp.float32), p['b2'][None, :],        # (DFF, E), (1, E)
        p['ln2_w'][None, :], p['ln2_b'][None, :],
    )

    # Single invocation, whole arrays as VMEM blocks (no grid, no per-step pipeline cost).
    out2d = pl.pallas_call(
        _encoder_layer_kernel,
        out_shape=jax.ShapeDtypeStruct((M, E), jnp.float32),
    )(x2d, attn_bias, *kparams)

    return out2d.reshape(L, N, E)


# ---------------- pure-JAX reference (for correctness check) ----------------
def _reference(x, p):
    hp = lax.Precision.HIGHEST
    L, N, E = x.shape
    qkv = jnp.einsum('lne,fe->lnf', x, p['wqkv'], precision=hp) + p['bqkv']
    q, k, v = jnp.split(qkv, 3, axis=-1)
    q = q * (HEAD_DIM ** -0.5)
    qh = q.reshape(L, N, NHEAD, HEAD_DIM)
    kh = k.reshape(L, N, NHEAD, HEAD_DIM)
    vh = v.reshape(L, N, NHEAD, HEAD_DIM)
    s = jnp.einsum('lnhd,mnhd->nhlm', qh, kh, precision=hp)
    a = jax.nn.softmax(s, axis=-1)
    o = jnp.einsum('nhlm,mnhd->lnhd', a, vh, precision=hp).reshape(L, N, E)
    attn = jnp.einsum('lne,fe->lnf', o, p['wo'], precision=hp) + p['bo']
    x = _layernorm(x + attn, p['ln1_w'], p['ln1_b'])
    h1 = jnp.einsum('lne,fe->lnf', x, p['w1'], precision=hp) + p['b1']
    ff = jnp.einsum('lnf,ef->lne', jnp.maximum(h1, 0.0), p['w2'], precision=hp) + p['b2']
    return _layernorm(h1 + ff, p['ln2_w'], p['ln2_b'])


def _init_params(key):
    E, F = D_MODEL, DIM_FF
    ks = jax.random.split(key, 6)
    s = 0.02
    return {
        'wqkv': s * jax.random.normal(ks[0], (3 * E, E), jnp.float32),
        'bqkv': s * jax.random.normal(ks[1], (3 * E,), jnp.float32),
        'wo':   s * jax.random.normal(ks[2], (E, E), jnp.float32),
        'bo':   jnp.zeros((E,), jnp.float32),
        'ln1_w': jnp.ones((E,), jnp.float32),
        'ln1_b': jnp.zeros((E,), jnp.float32),
        'w1':   s * jax.random.normal(ks[3], (F, E), jnp.float32),
        'b1':   s * jax.random.normal(ks[4], (F,), jnp.float32),
        'w2':   s * jax.random.normal(ks[5], (E, F), jnp.float32),
        'b2':   jnp.zeros((E,), jnp.float32),
        'ln2_w': jnp.ones((E,), jnp.float32),
        'ln2_b': jnp.zeros((E,), jnp.float32),
    }


if __name__ == "__main__":
    # TODO(synk): dropout layers are treated as identity (eval mode); stochastic
    # training-time dropout is not reproduced.
    L, N = 8, 2
    key = jax.random.PRNGKey(0)
    k_src, k_par = jax.random.split(key)
    src = jax.random.normal(k_src, (L, N, D_MODEL), jnp.float32)
    params = _init_params(k_par)

    out = transformer_encoder_layer(src, params)
    out = jax.block_until_ready(out)

    ref = _reference(src, params)
    assert out.shape == (L, N, D_MODEL)
    err = float(jnp.max(jnp.abs(out - ref)))
    # Tolerance covers MXU precision differences (final LayerNorm amplifies ~10x);
    # structural errors would be O(1).
    assert jnp.allclose(out, ref, atol=1e-2, rtol=1e-2), err
    print("KERNEL_OK")
</pallas_src>

<mosaic_0001>
module attributes {stable_mosaic.version = 11 : i64} {
  func.func @_encoder_layer_kernel(%arg0: memref<16x32xf32, #tpu.memory_space<vmem>>, %arg1: memref<16x16xf32, #tpu.memory_space<vmem>>, %arg2: memref<32x96xf32, #tpu.memory_space<vmem>>, %arg3: memref<1x96xf32, #tpu.memory_space<vmem>>, %arg4: memref<32x32xf32, #tpu.memory_space<vmem>>, %arg5: memref<1x32xf32, #tpu.memory_space<vmem>>, %arg6: memref<1x32xf32, #tpu.memory_space<vmem>>, %arg7: memref<1x32xf32, #tpu.memory_space<vmem>>, %arg8: memref<32x32xf32, #tpu.memory_space<vmem>>, %arg9: memref<1x32xf32, #tpu.memory_space<vmem>>, %arg10: memref<32x32xf32, #tpu.memory_space<vmem>>, %arg11: memref<1x32xf32, #tpu.memory_space<vmem>>, %arg12: memref<1x32xf32, #tpu.memory_space<vmem>>, %arg13: memref<1x32xf32, #tpu.memory_space<vmem>>, %arg14: memref<16x32xf32, #tpu.memory_space<vmem>>) attributes {dimension_semantics = [], scalar_prefetch = 0 : i64, scratch_operands = 0 : i64, tpu.core_type = #tpu.core_type<tc>} {
    %c0 = arith.constant 0 : index
    %c0_0 = arith.constant 0 : index
    %0 = vector.load %arg0[%c0, %c0_0] : memref<16x32xf32, #tpu.memory_space<vmem>>, vector<16x32xf32>
    %c0_1 = arith.constant 0 : index
    %c0_2 = arith.constant 0 : index
    %1 = vector.load %arg2[%c0_1, %c0_2] : memref<32x96xf32, #tpu.memory_space<vmem>>, vector<32x96xf32>
    %cst = arith.constant dense<0.000000e+00> : vector<16x96xf32>
    %2 = tpu.matmul %0, %1, %cst {dimension_numbers = #tpu.dot_dimension_numbers<[1], [0], [0], [1], [0, 0, 1, 1], [], []>} : vector<16x32xf32>, vector<32x96xf32>, vector<16x96xf32> -> vector<16x96xf32>
    %c0_3 = arith.constant 0 : index
    %c0_4 = arith.constant 0 : index
    %3 = vector.load %arg3[%c0_3, %c0_4] : memref<1x96xf32, #tpu.memory_space<vmem>>, vector<1x96xf32>
    %4 = vector.broadcast %3 : vector<1x96xf32> to vector<16x96xf32>
    %5 = arith.addf %2, %4 : vector<16x96xf32>
    %c0_5 = arith.constant 0 : index
    %c0_6 = arith.constant 0 : index
    %6 = vector.load %arg1[%c0_5, %c0_6] : memref<16x16xf32, #tpu.memory_space<vmem>>, vector<16x16xf32>
    %c0_7 = arith.constant 0 : index
    %c0_8 = arith.constant 0 : index
    %7 = vector.load %arg4[%c0_7, %c0_8] : memref<32x32xf32, #tpu.memory_space<vmem>>, vector<32x32xf32>
    %cst_9 = arith.constant 0.000000e+00 : f32
    %8 = vector.broadcast %cst_9 : f32 to vector<16x32xf32>
    %9 = vector.extract_strided_slice %5 {offsets = [0, 0], sizes = [16, 8], strides = [1, 1]} : vector<16x96xf32> to vector<16x8xf32>
    %10 = vector.extract_strided_slice %5 {offsets = [0, 32], sizes = [16, 8], strides = [1, 1]} : vector<16x96xf32> to vector<16x8xf32>
    %11 = vector.extract_strided_slice %5 {offsets = [0, 64], sizes = [16, 8], strides = [1, 1]} : vector<16x96xf32> to vector<16x8xf32>
    %cst_10 = arith.constant dense<0.000000e+00> : vector<16x16xf32>
    %12 = tpu.matmul %9, %10, %cst_10 {dimension_numbers = #tpu.dot_dimension_numbers<[1], [1], [0], [0], [0, 0, 1, 0], [], []>} : vector<16x8xf32>, vector<16x8xf32>, vector<16x16xf32> -> vector<16x16xf32>
    %13 = arith.addf %12, %6 : vector<16x16xf32>
    %cst_11 = arith.constant dense<0xFF800000> : vector<16xf32>
    %14 = vector.multi_reduction <maximumf>, %13, %cst_11 [1] : vector<16x16xf32> to vector<16xf32>
    %15 = vector.shape_cast %14 : vector<16xf32> to vector<16x1xf32>
    %16 = vector.broadcast %15 : vector<16x1xf32> to vector<16x16xf32>
    %17 = arith.subf %13, %16 : vector<16x16xf32>
    %18 = math.exp %17 : vector<16x16xf32>
    %cst_12 = arith.constant dense<0.000000e+00> : vector<16xf32>
    %19 = vector.multi_reduction <add>, %18, %cst_12 [1] : vector<16x16xf32> to vector<16xf32>
    %20 = vector.shape_cast %19 : vector<16xf32> to vector<16x1xf32>
    %21 = vector.broadcast %20 : vector<16x1xf32> to vector<16x16xf32>
    %22 = arith.divf %18, %21 : vector<16x16xf32>
    %cst_13 = arith.constant dense<0.000000e+00> : vector<16x8xf32>
    %23 = tpu.matmul %22, %11, %cst_13 {dimension_numbers = #tpu.dot_dimension_numbers<[1], [0], [0], [1], [0, 0, 1, 1], [], []>} : vector<16x16xf32>, vector<16x8xf32>, vector<16x8xf32> -> vector<16x8xf32>
    %24 = vector.extract_strided_slice %7 {offsets = [0, 0], sizes = [8, 32], strides = [1, 1]} : vector<32x32xf32> to vector<8x32xf32>
    %cst_14 = arith.constant dense<0.000000e+00> : vector<16x32xf32>
    %25 = tpu.matmul %23, %24, %cst_14 {dimension_numbers = #tpu.dot_dimension_numbers<[1], [0], [0], [1], [0, 0, 1, 1], [], []>} : vector<16x8xf32>, vector<8x32xf32>, vector<16x32xf32> -> vector<16x32xf32>
    %26 = arith.addf %8, %25 : vector<16x32xf32>
    %27 = vector.extract_strided_slice %5 {offsets = [0, 8], sizes = [16, 8], strides = [1, 1]} : vector<16x96xf32> to vector<16x8xf32>
    %28 = vector.extract_strided_slice %5 {offsets = [0, 40], sizes = [16, 8], strides = [1, 1]} : vector<16x96xf32> to vector<16x8xf32>
    %29 = vector.extract_strided_slice %5 {offsets = [0, 72], sizes = [16, 8], strides = [1, 1]} : vector<16x96xf32> to vector<16x8xf32>
    %cst_15 = arith.constant dense<0.000000e+00> : vector<16x16xf32>
    %30 = tpu.matmul %27, %28, %cst_15 {dimension_numbers = #tpu.dot_dimension_numbers<[1], [1], [0], [0], [0, 0, 1, 0], [], []>} : vector<16x8xf32>, vector<16x8xf32>, vector<16x16xf32> -> vector<16x16xf32>
    %31 = arith.addf %30, %6 : vector<16x16xf32>
    %cst_16 = arith.constant dense<0xFF800000> : vector<16xf32>
    %32 = vector.multi_reduction <maximumf>, %31, %cst_16 [1] : vector<16x16xf32> to vector<16xf32>
    %33 = vector.shape_cast %32 : vector<16xf32> to vector<16x1xf32>
    %34 = vector.broadcast %33 : vector<16x1xf32> to vector<16x16xf32>
    %35 = arith.subf %31, %34 : vector<16x16xf32>
    %36 = math.exp %35 : vector<16x16xf32>
    %cst_17 = arith.constant dense<0.000000e+00> : vector<16xf32>
    %37 = vector.multi_reduction <add>, %36, %cst_17 [1] : vector<16x16xf32> to vector<16xf32>
    %38 = vector.shape_cast %37 : vector<16xf32> to vector<16x1xf32>
    %39 = vector.broadcast %38 : vector<16x1xf32> to vector<16x16xf32>
    %40 = arith.divf %36, %39 : vector<16x16xf32>
    %cst_18 = arith.constant dense<0.000000e+00> : vector<16x8xf32>
    %41 = tpu.matmul %40, %29, %cst_18 {dimension_numbers = #tpu.dot_dimension_numbers<[1], [0], [0], [1], [0, 0, 1, 1], [], []>} : vector<16x16xf32>, vector<16x8xf32>, vector<16x8xf32> -> vector<16x8xf32>
    %42 = vector.extract_strided_slice %7 {offsets = [8, 0], sizes = [8, 32], strides = [1, 1]} : vector<32x32xf32> to vector<8x32xf32>
    %cst_19 = arith.constant dense<0.000000e+00> : vector<16x32xf32>
    %43 = tpu.matmul %41, %42, %cst_19 {dimension_numbers = #tpu.dot_dimension_numbers<[1], [0], [0], [1], [0, 0, 1, 1], [], []>} : vector<16x8xf32>, vector<8x32xf32>, vector<16x32xf32> -> vector<16x32xf32>
    %44 = arith.addf %26, %43 : vector<16x32xf32>
    %45 = vector.extract_strided_slice %5 {offsets = [0, 16], sizes = [16, 8], strides = [1, 1]} : vector<16x96xf32> to vector<16x8xf32>
    %46 = vector.extract_strided_slice %5 {offsets = [0, 48], sizes = [16, 8], strides = [1, 1]} : vector<16x96xf32> to vector<16x8xf32>
    %47 = vector.extract_strided_slice %5 {offsets = [0, 80], sizes = [16, 8], strides = [1, 1]} : vector<16x96xf32> to vector<16x8xf32>
    %cst_20 = arith.constant dense<0.000000e+00> : vector<16x16xf32>
    %48 = tpu.matmul %45, %46, %cst_20 {dimension_numbers = #tpu.dot_dimension_numbers<[1], [1], [0], [0], [0, 0, 1, 0], [], []>} : vector<16x8xf32>, vector<16x8xf32>, vector<16x16xf32> -> vector<16x16xf32>
    %49 = arith.addf %48, %6 : vector<16x16xf32>
    %cst_21 = arith.constant dense<0xFF800000> : vector<16xf32>
    %50 = vector.multi_reduction <maximumf>, %49, %cst_21 [1] : vector<16x16xf32> to vector<16xf32>
    %51 = vector.shape_cast %50 : vector<16xf32> to vector<16x1xf32>
    %52 = vector.broadcast %51 : vector<16x1xf32> to vector<16x16xf32>
    %53 = arith.subf %49, %52 : vector<16x16xf32>
    %54 = math.exp %53 : vector<16x16xf32>
    %cst_22 = arith.constant dense<0.000000e+00> : vector<16xf32>
    %55 = vector.multi_reduction <add>, %54, %cst_22 [1] : vector<16x16xf32> to vector<16xf32>
    %56 = vector.shape_cast %55 : vector<16xf32> to vector<16x1xf32>
    %57 = vector.broadcast %56 : vector<16x1xf32> to vector<16x16xf32>
    %58 = arith.divf %54, %57 : vector<16x16xf32>
    %cst_23 = arith.constant dense<0.000000e+00> : vector<16x8xf32>
    %59 = tpu.matmul %58, %47, %cst_23 {dimension_numbers = #tpu.dot_dimension_numbers<[1], [0], [0], [1], [0, 0, 1, 1], [], []>} : vector<16x16xf32>, vector<16x8xf32>, vector<16x8xf32> -> vector<16x8xf32>
    %60 = vector.extract_strided_slice %7 {offsets = [16, 0], sizes = [8, 32], strides = [1, 1]} : vector<32x32xf32> to vector<8x32xf32>
    %cst_24 = arith.constant dense<0.000000e+00> : vector<16x32xf32>
    %61 = tpu.matmul %59, %60, %cst_24 {dimension_numbers = #tpu.dot_dimension_numbers<[1], [0], [0], [1], [0, 0, 1, 1], [], []>} : vector<16x8xf32>, vector<8x32xf32>, vector<16x32xf32> -> vector<16x32xf32>
    %62 = arith.addf %44, %61 : vector<16x32xf32>
    %63 = vector.extract_strided_slice %5 {offsets = [0, 24], sizes = [16, 8], strides = [1, 1]} : vector<16x96xf32> to vector<16x8xf32>
    %64 = vector.extract_strided_slice %5 {offsets = [0, 56], sizes = [16, 8], strides = [1, 1]} : vector<16x96xf32> to vector<16x8xf32>
    %65 = vector.extract_strided_slice %5 {offsets = [0, 88], sizes = [16, 8], strides = [1, 1]} : vector<16x96xf32> to vector<16x8xf32>
    %cst_25 = arith.constant dense<0.000000e+00> : vector<16x16xf32>
    %66 = tpu.matmul %63, %64, %cst_25 {dimension_numbers = #tpu.dot_dimension_numbers<[1], [1], [0], [0], [0, 0, 1, 0], [], []>} : vector<16x8xf32>, vector<16x8xf32>, vector<16x16xf32> -> vector<16x16xf32>
    %67 = arith.addf %66, %6 : vector<16x16xf32>
    %cst_26 = arith.constant dense<0xFF800000> : vector<16xf32>
    %68 = vector.multi_reduction <maximumf>, %67, %cst_26 [1] : vector<16x16xf32> to vector<16xf32>
    %69 = vector.shape_cast %68 : vector<16xf32> to vector<16x1xf32>
    %70 = vector.broadcast %69 : vector<16x1xf32> to vector<16x16xf32>
    %71 = arith.subf %67, %70 : vector<16x16xf32>
    %72 = math.exp %71 : vector<16x16xf32>
    %cst_27 = arith.constant dense<0.000000e+00> : vector<16xf32>
    %73 = vector.multi_reduction <add>, %72, %cst_27 [1] : vector<16x16xf32> to vector<16xf32>
    %74 = vector.shape_cast %73 : vector<16xf32> to vector<16x1xf32>
    %75 = vector.broadcast %74 : vector<16x1xf32> to vector<16x16xf32>
    %76 = arith.divf %72, %75 : vector<16x16xf32>
    %cst_28 = arith.constant dense<0.000000e+00> : vector<16x8xf32>
    %77 = tpu.matmul %76, %65, %cst_28 {dimension_numbers = #tpu.dot_dimension_numbers<[1], [0], [0], [1], [0, 0, 1, 1], [], []>} : vector<16x16xf32>, vector<16x8xf32>, vector<16x8xf32> -> vector<16x8xf32>
    %78 = vector.extract_strided_slice %7 {offsets = [24, 0], sizes = [8, 32], strides = [1, 1]} : vector<32x32xf32> to vector<8x32xf32>
    %cst_29 = arith.constant dense<0.000000e+00> : vector<16x32xf32>
    %79 = tpu.matmul %77, %78, %cst_29 {dimension_numbers = #tpu.dot_dimension_numbers<[1], [0], [0], [1], [0, 0, 1, 1], [], []>} : vector<16x8xf32>, vector<8x32xf32>, vector<16x32xf32> -> vector<16x32xf32>
    %80 = arith.addf %62, %79 : vector<16x32xf32>
    %c0_30 = arith.constant 0 : index
    %c0_31 = arith.constant 0 : index
    %81 = vector.load %arg5[%c0_30, %c0_31] : memref<1x32xf32, #tpu.memory_space<vmem>>, vector<1x32xf32>
    %82 = vector.broadcast %81 : vector<1x32xf32> to vector<16x32xf32>
    %83 = arith.addf %80, %82 : vector<16x32xf32>
    %84 = arith.addf %0, %83 : vector<16x32xf32>
    %c0_32 = arith.constant 0 : index
    %c0_33 = arith.constant 0 : index
    %85 = vector.load %arg6[%c0_32, %c0_33] : memref<1x32xf32, #tpu.memory_space<vmem>>, vector<1x32xf32>
    %c0_34 = arith.constant 0 : index
    %c0_35 = arith.constant 0 : index
    %86 = vector.load %arg7[%c0_34, %c0_35] : memref<1x32xf32, #tpu.memory_space<vmem>>, vector<1x32xf32>
    %cst_36 = arith.constant dense<0.000000e+00> : vector<16xf32>
    %87 = vector.multi_reduction <add>, %84, %cst_36 [1] : vector<16x32xf32> to vector<16xf32>
    %88 = vector.shape_cast %87 : vector<16xf32> to vector<16x1xf32>
    %cst_37 = arith.constant 3.200000e+01 : f32
    %89 = vector.broadcast %cst_37 : f32 to vector<16x1xf32>
    %90 = arith.divf %88, %89 : vector<16x1xf32>
    %91 = vector.broadcast %90 : vector<16x1xf32> to vector<16x32xf32>
    %92 = arith.subf %84, %91 : vector<16x32xf32>
    %93 = arith.mulf %92, %92 : vector<16x32xf32>
    %cst_38 = arith.constant dense<0.000000e+00> : vector<16xf32>
    %94 = vector.multi_reduction <add>, %93, %cst_38 [1] : vector<16x32xf32> to vector<16xf32>
    %95 = vector.shape_cast %94 : vector<16xf32> to vector<16x1xf32>
    %cst_39 = arith.constant 3.200000e+01 : f32
    %96 = vector.broadcast %cst_39 : f32 to vector<16x1xf32>
    %97 = arith.divf %95, %96 : vector<16x1xf32>
    %98 = vector.broadcast %90 : vector<16x1xf32> to vector<16x32xf32>
    %99 = arith.subf %84, %98 : vector<16x32xf32>
    %cst_40 = arith.constant 9.99999974E-6 : f32
    %100 = vector.broadcast %cst_40 : f32 to vector<16x1xf32>
    %101 = arith.addf %97, %100 : vector<16x1xf32>
    %102 = math.rsqrt %101 : vector<16x1xf32>
    %103 = vector.broadcast %102 : vector<16x1xf32> to vector<16x32xf32>
    %104 = arith.mulf %99, %103 : vector<16x32xf32>
    %105 = vector.broadcast %85 : vector<1x32xf32> to vector<16x32xf32>
    %106 = arith.mulf %104, %105 : vector<16x32xf32>
    %107 = vector.broadcast %86 : vector<1x32xf32> to vector<16x32xf32>
    %108 = arith.addf %106, %107 : vector<16x32xf32>
    %c0_41 = arith.constant 0 : index
    %c0_42 = arith.constant 0 : index
    %109 = vector.load %arg8[%c0_41, %c0_42] : memref<32x32xf32, #tpu.memory_space<vmem>>, vector<32x32xf32>
    %cst_43 = arith.constant dense<0.000000e+00> : vector<16x32xf32>
    %110 = tpu.matmul %108, %109, %cst_43 {dimension_numbers = #tpu.dot_dimension_numbers<[1], [0], [0], [1], [0, 0, 1, 1], [], []>} : vector<16x32xf32>, vector<32x32xf32>, vector<16x32xf32> -> vector<16x32xf32>
    %c0_44 = arith.constant 0 : index
    %c0_45 = arith.constant 0 : index
    %111 = vector.load %arg9[%c0_44, %c0_45] : memref<1x32xf32, #tpu.memory_space<vmem>>, vector<1x32xf32>
    %112 = vector.broadcast %111 : vector<1x32xf32> to vector<16x32xf32>
    %113 = arith.addf %110, %112 : vector<16x32xf32>
    %cst_46 = arith.constant 0.000000e+00 : f32
    %114 = vector.broadcast %cst_46 : f32 to vector<16x32xf32>
    %115 = arith.maximumf %113, %114 : vector<16x32xf32>
    %c0_47 = arith.constant 0 : index
    %c0_48 = arith.constant 0 : index
    %116 = vector.load %arg10[%c0_47, %c0_48] : memref<32x32xf32, #tpu.memory_space<vmem>>, vector<32x32xf32>
    %cst_49 = arith.constant dense<0.000000e+00> : vector<16x32xf32>
    %117 = tpu.matmul %115, %116, %cst_49 {dimension_numbers = #tpu.dot_dimension_numbers<[1], [0], [0], [1], [0, 0, 1, 1], [], []>} : vector<16x32xf32>, vector<32x32xf32>, vector<16x32xf32> -> vector<16x32xf32>
    %c0_50 = arith.constant 0 : index
    %c0_51 = arith.constant 0 : index
    %118 = vector.load %arg11[%c0_50, %c0_51] : memref<1x32xf32, #tpu.memory_space<vmem>>, vector<1x32xf32>
    %119 = vector.broadcast %118 : vector<1x32xf32> to vector<16x32xf32>
    %120 = arith.addf %117, %119 : vector<16x32xf32>
    %121 = arith.addf %113, %120 : vector<16x32xf32>
    %c0_52 = arith.constant 0 : index
    %c0_53 = arith.constant 0 : index
    %122 = vector.load %arg12[%c0_52, %c0_53] : memref<1x32xf32, #tpu.memory_space<vmem>>, vector<1x32xf32>
    %c0_54 = arith.constant 0 : index
    %c0_55 = arith.constant 0 : index
    %123 = vector.load %arg13[%c0_54, %c0_55] : memref<1x32xf32, #tpu.memory_space<vmem>>, vector<1x32xf32>
    %cst_56 = arith.constant dense<0.000000e+00> : vector<16xf32>
    %124 = vector.multi_reduction <add>, %121, %cst_56 [1] : vector<16x32xf32> to vector<16xf32>
    %125 = vector.shape_cast %124 : vector<16xf32> to vector<16x1xf32>
    %cst_57 = arith.constant 3.200000e+01 : f32
    %126 = vector.broadcast %cst_57 : f32 to vector<16x1xf32>
    %127 = arith.divf %125, %126 : vector<16x1xf32>
    %128 = vector.broadcast %127 : vector<16x1xf32> to vector<16x32xf32>
    %129 = arith.subf %121, %128 : vector<16x32xf32>
    %130 = arith.mulf %129, %129 : vector<16x32xf32>
    %cst_58 = arith.constant dense<0.000000e+00> : vector<16xf32>
    %131 = vector.multi_reduction <add>, %130, %cst_58 [1] : vector<16x32xf32> to vector<16xf32>
    %132 = vector.shape_cast %131 : vector<16xf32> to vector<16x1xf32>
    %cst_59 = arith.constant 3.200000e+01 : f32
    %133 = vector.broadcast %cst_59 : f32 to vector<16x1xf32>
    %134 = arith.divf %132, %133 : vector<16x1xf32>
    %135 = vector.broadcast %127 : vector<16x1xf32> to vector<16x32xf32>
    %136 = arith.subf %121, %135 : vector<16x32xf32>
    %cst_60 = arith.constant 9.99999974E-6 : f32
    %137 = vector.broadcast %cst_60 : f32 to vector<16x1xf32>
    %138 = arith.addf %134, %137 : vector<16x1xf32>
    %139 = math.rsqrt %138 : vector<16x1xf32>
    %140 = vector.broadcast %139 : vector<16x1xf32> to vector<16x32xf32>
    %141 = arith.mulf %136, %140 : vector<16x32xf32>
    %142 = vector.broadcast %122 : vector<1x32xf32> to vector<16x32xf32>
    %143 = arith.mulf %141, %142 : vector<16x32xf32>
    %144 = vector.broadcast %123 : vector<1x32xf32> to vector<16x32xf32>
    %145 = arith.addf %143, %144 : vector<16x32xf32>
    %c0_61 = arith.constant 0 : index
    %c0_62 = arith.constant 0 : index
    %146 = vector.load %arg14[%c0_61, %c0_62] : memref<16x32xf32, #tpu.memory_space<vmem>>, vector<16x32xf32>
    tpu.vector_store %arg14[%c0_61, %c0_62], %145 {strides = array<i32>} : memref<16x32xf32, #tpu.memory_space<vmem>>, vector<16x32xf32>,
    return
  }
}

</mosaic_0001>

<bundles_post_ra>
// kernel: transformer_encoder_layer.1
= control target key start
LH: loop header
LB: loop body
LE: loop exit
PB: predicated region body
PF: predicated region fallthrough
CT: control target
= control target key end

     0   :  { %s1418_s0 = inlined_call_operand.vmem [shape: f32[16,32], index: 0, kind: input, shape index: {}]   ;;  %s1419_s1 = inlined_call_operand.vmem [shape: f32[16,16], index: 1, kind: input, shape index: {}]   ;;  %s1420_s2 = inlined_call_operand.vmem [shape: f32[32,96], index: 2, kind: input, shape index: {}]   ;;  %s1421_s3 = inlined_call_operand.vmem [shape: f32[1,96], index: 3, kind: input, shape index: {}]   ;;  %s1422_s4 = inlined_call_operand.vmem [shape: f32[32,32], index: 4, kind: input, shape index: {}]   ;;  %s1423_s5 = inlined_call_operand.vmem [shape: f32[1,32], index: 5, kind: input, shape index: {}]   ;;  %s1424_s6 = inlined_call_operand.vmem [shape: f32[1,32], index: 6, kind: input, shape index: {}]   ;;  %s1425_s7 = inlined_call_operand.vmem [shape: f32[1,32], index: 7, kind: input, shape index: {}]   ;;  %s1426_s8 = inlined_call_operand.vmem [shape: f32[32,32], index: 8, kind: input, shape index: {}]   ;;  %s1427_s9 = inlined_call_operand.vmem [shape: f32[1,32], index: 9, kind: input, shape index: {}]   ;;  %s1428_s10 = inlined_call_operand.vmem [shape: f32[32,32], index: 10, kind: input, shape index: {}]   ;;  %s1429_s11 = inlined_call_operand.vmem [shape: f32[1,32], index: 11, kind: input, shape index: {}]   ;;  %s1430_s12 = inlined_call_operand.vmem [shape: f32[1,32], index: 12, kind: input, shape index: {}]   ;;  %s1431_s13 = inlined_call_operand.vmem [shape: f32[1,32], index: 13, kind: input, shape index: {}]   ;;  %s1432_s14 = inlined_call_operand.hbm [shape: f32[16,32], index: 14, kind: output, shape index: {}]  }
   0x1   :  { %v53_v0 = vld [vmem:[%s1420_s2 + $0x18] sm:$0xff]  ;;  %v52_v1 = vld [vmem:[%s1420_s2 + $0x10] sm:$0xff]  ;;  %v51_v2 = vld [vmem:[%s1420_s2 + $0x8] sm:$0xff] }
   0x2   :  { %965 = vmatpush.msra.mxu3 %v53_v0  ;;  %77 = vmatpush.msra.mxu0 %v53_v0  ;;  %v50_v3 = vld [vmem:[%s1420_s2] sm:$0xff] }
   0x4   :  { %966 = vmatpush.msra.mxu3 %v52_v1  ;;  %78 = vmatpush.msra.mxu0 %v52_v1 }
   0x5   :  { %19 = vsyncpa [#allocation3], 0  ;;  %v1185_v4 = vld [vmem:[%s1418_s0 + $0x8] sm:$0xff]  ;;  %vm58_vm0 = vcmask 261120   ;;  %v1190_v5 = vld [vmem:[%s1418_s0] sm:$0xff]  ;;  %s1080_s26 = smov 96  }
   0x6   :  { %967 = vmatpush.msra.mxu3 %v51_v2  ;;  %79 = vmatpush.msra.mxu0 %v51_v2  ;;  %v1004_v6 = vld [vmem:[%s1421_s3] ss:$0 sm:$0xff]  ;;  %s1081_s0 = smov 64   ;;  %s1082_s27 = smov 120   ;;  %vm100_vm1 = vcmask 64512   ;;  %vm132_vm2 = vcmask 130048  }
   0x7   :  { %s1083_s3 = smov 80   ;;  %s1084_s28 = smov 72   ;;  %v1220_v17 = vld [vmem:[%s1419_s1] sm:$0xff]  ;;  %v1227_v21 = vld [vmem:[%s1419_s1 + $0x8] sm:$0xff] }
   0x8   :  { %968 = vmatpush.msra.mxu3 %v50_v3  ;;  %80 = vmatpush.msra.mxu0 %v50_v3  ;;  %s1085_s29 = smov 112   ;;  %s1086_s18 = smov 88   ;;  %v90_v36 = vld [vmem:[%s1422_s4] sm:$0xff] }
   0x9   :  { %928 = vmatmul.msk.f32.vlgmr.msra.gmra.mxu3 %vm58_vm0, %v1185_v4  ;;  %927 = vmatmul.msk.f32.vlgmr.msra.gmra.mxu0 %vm58_vm0, %v1190_v5  ;;  %s1087_s19 = smov 104   ;;  %s1088_s21 = smov 48  }
   0xa   :  { %s1089_s22 = smov 56   ;;  %s1090_s23 = smov 40  }
   0xb   :  { %s915_s30 = sshll.u32 %s1432_s14, 4  ;;  %s1094_s15 = smov 8   ;;  %s916_s30 = int_to_ptr.hbm [resolvable:$true] %s915_s30 }
  0x86   :  { %v82_v9 = vpop.f32.mrf.mxu0 }
  0x87   :  { %v83_v10 = vadd.f32 %v1004_v6, %v82_v9 }
  0x8c   :  { %v85_v7 = vpop.f32.mrf.mxu3 }
  0x8d   :  { %v1199_v8 = vadd.f32 %v1004_v6, %v85_v7 }
  0x8f   :  { %98 = vrot.lane.b32.xlu0 %v1199_v8, %s1080_s26  ;;  %v1203_v11 = vpack.i.bf16 %v83_v10, %v1199_v8 }
  0x97   :  { %96 = vrot.lane.b32.xlu0 %v83_v10, %s1080_s26 }
  0x9f   :  { %985 = vrot.lane.b32.xlu0 %v1203_v11, %s1081_s0 }
  0xa7   :  { %216 = vrot.lane.b32.xlu0 %v83_v10, %s1082_s27 }
  0xaf   :  { %218 = vrot.lane.b32.xlu0 %v1199_v8, %s1082_s27 }
  0xb7   :  { %402 = vrot.lane.b32.xlu0 %v1199_v8, %s1083_s3 }
  0xbf   :  { %553 = vrot.lane.b32.xlu0 %v83_v10, %s1084_s28 }
  0xc7   :  { %398 = vrot.lane.b32.xlu0 %v1199_v8, %s1085_s29 }
 0x101   :  { %v99_v12 = vpop.permute.xlu0 %98 }
 0x102   :  { %929 = vmatpush.xpose.msk.msra.mxu1 %vm100_vm1, %v99_v12 }
 0x109   :  { %v97_v13 = vpop.permute.xlu0 %96 }
 0x10a   :  { %930 = vmatpush.xpose.msk.msra.mxu1 %vm100_vm1, %v97_v13 }
 0x10d   :  { %931 = vmatmul.msk.f32.vlgmr.msra.gmra.mxu1 %vm100_vm1, %v83_v10 }
 0x10e   :  { %388 = vmatpush.msrb.mxu1 %v90_v36 }
 0x111   :  { %v986_v14 = vpop.permute.xlu0 %985 }
 0x112   :  { %v987_v15 = vunpack.i.l.bf16 %v986_v14  ;;  %v988_v16 = vunpack.i.h.bf16 %v986_v14 }
 0x114   :  { %207 = vmatpush.msra.mxu2 %v987_v15 }
 0x115   :  { %932 = vmatmul.msk.f32.gmra.mxu1 %vm100_vm1, %v1199_v8 }
 0x116   :  { %208 = vmatpush.msra.mxu2 %v988_v16 }
 0x119   :  { %v217_v37 = vpop.permute.xlu0 %216 }
 0x121   :  { %v219_v40 = vpop.permute.xlu0 %218 }
 0x129   :  { %v403_v53 = vpop.permute.xlu0 %402 }
 0x131   :  { %v554_v3 = vpop.permute.xlu0 %553 }
 0x139   :  { %v399_v7 = vpop.permute.xlu0 %398 }
 0x18a   :  { %v126_v18 = vpop.f32.mrf.mxu1 }
 0x18b   :  { %v127_v19 = vadd.f32 %v126_v18, %v1220_v17 }
 0x18d   :  { %v133_v20 = vsel %vm132_vm2, %v127_v19, -inf }
 0x18e   :  { %134 = vmax.xlane.f32.xlu1 %v133_v20 }
 0x192   :  { %v129_v22 = vpop.f32.mrf.mxu1 }
 0x193   :  { %v130_v23 = vadd.f32 %v129_v22, %v1227_v21 }
 0x195   :  { %v136_v24 = vsel %vm132_vm2, %v130_v23, -inf }
 0x196   :  { %137 = vmax.xlane.f32.xlu1 %v136_v24 }
 0x1af   :  { %222 = vrot.lane.b32.xlu1 %v1199_v8, %s1086_s18 }
 0x1b7   :  { %400 = vrot.lane.b32.xlu1 %v83_v10, %s1083_s3 }
 0x1bf   :  { %549 = vrot.lane.b32.xlu1 %v83_v10, %s1087_s19 }
 0x201   :  { %v135_v25 = vpop.xlane.xlu1 %134 }
 0x202   :  { %v139_v26 = vsub.f32 %v127_v19, %v135_v25 }
 0x204   :  { %v141_v27 = vmul.f32 1.442695, %v139_v26 }
 0x206   :  { %1012 = vpow2.f32 %v141_v27 }
 0x209   :  { %v138_v28 = vpop.xlane.xlu1 %137 }
 0x20a   :  { %v140_v29 = vsub.f32 %v130_v23, %v138_v28 }
 0x20c   :  { %v1013_v30 = vpop.eup %1012  ;;  %v143_v31 = vmul.f32 1.442695, %v140_v29 }
 0x20d   :  { %v145_v32 = vsel %vm132_vm2, %v1013_v30, 0.0 }
 0x20e   :  { %1014 = vpow2.f32 %v143_v31  ;;  %146 = vadd.xlane.f32.xlu2 %v145_v32 }
 0x214   :  { %v1015_v33 = vpop.eup %1014 }
 0x215   :  { %v148_v34 = vsel %vm132_vm2, %v1015_v33, 0.0 }
 0x216   :  { %149 = vadd.xlane.f32.xlu2 %v148_v34 }
 0x221   :  { %v223_v35 = vpop.permute.xlu1 %222 }
 0x222   :  { %935 = vmatpush.xpose.msk.msrb.mxu3 %vm100_vm1, %v223_v35 }
 0x229   :  { %v401_v60 = vpop.permute.xlu1 %400 }
 0x22e   :  { %220 = vrot.lane.b32.xlu2 %v83_v10, %s1086_s18 }
 0x231   :  { %v550_v18 = vpop.permute.xlu1 %549 }
 0x236   :  { %555 = vrot.lane.b32.xlu2 %v1199_v8, %s1084_s28 }
 0x23e   :  { %396 = vrot.lane.b32.xlu2 %v83_v10, %s1085_s29 }
 0x246   :  { %551 = vrot.lane.b32.xlu2 %v1199_v8, %s1087_s19 }
 0x281   :  { %v147_v38 = vpop.xlane.xlu2 %146 }
 0x282   :  { %1016 = vrcp.f32 %v147_v38  ;;  %v162_v44 = vand.u32 2147483648, %v147_v38  ;;  %v160_v46 = vand.u32 2147483647, %v147_v38  ;;  %vm156_vm4 = vweird.f32 %v147_v38 }
 0x284   :  { %v163_v49 = vor.u32 1.1754944e-38, %v162_v44  ;;  %vm161_vm6 = vcmp.eq.f32.partialorder %v160_v46, 8.507059e+37 }
 0x288   :  { %v1017_v39 = vpop.eup %1016 }
 0x289   :  { %v152_v41 = vmul.f32 %v1017_v39, %v147_v38  ;;  %v150_v42 = vpop.xlane.xlu2 %149  ;;  %vm157_vm3 = vweird.f32 %v1017_v39 }
 0x28a   :  { %1018 = vrcp.f32 %v150_v42  ;;  %vm158_vm5 = vmor %vm156_vm4, %vm157_vm3  ;;  %v177_v57 = vand.u32 2147483648, %v150_v42  ;;  %v175_v59 = vand.u32 2147483647, %v150_v42  ;;  %vm171_vm8 = vweird.f32 %v150_v42 }
 0x28b   :  { %v153_v43 = vsub.f32 1.0, %v152_v41 }
 0x28c   :  { %v178_v62 = vor.u32 1.1754944e-38, %v177_v57  ;;  %vm176_vm10 = vcmp.eq.f32.partialorder %v175_v59, 8.507059e+37 }
 0x28d   :  { %v154_v45 = vmul.f32 %v1017_v39, %v153_v43 }
 0x28f   :  { %v155_v47 = vadd.f32 %v1017_v39, %v154_v45 }
 0x290   :  { %v1019_v48 = vpop.eup %1018 }
 0x291   :  { %v167_v50 = vmul.f32 %v1019_v48, %v150_v42  ;;  %v221_v51 = vpop.permute.xlu2 %220  ;;  %v159_v52 = vsel %vm158_vm5, %v1017_v39, %v155_v47  ;;  %vm172_vm7 = vweird.f32 %v1019_v48 }
 0x292   :  { %936 = vmatpush.xpose.msk.msrb.mxu3 %vm100_vm1, %v221_v51  ;;  %v164_v54 = vsel %vm161_vm6, %v163_v49, %v159_v52  ;;  %vm173_vm9 = vmor %vm171_vm8, %vm172_vm7 }
 0x293   :  { %v168_v55 = vsub.f32 1.0, %v167_v50  ;;  %v165_v56 = vmul.f32 %v1013_v30, %v164_v54 }
 0x295   :  { %v169_v58 = vmul.f32 %v1019_v48, %v168_v55  ;;  %933 = vmatmul.msk.f32.vlgmr.msra.gmra.mxu2 %vm132_vm2, %v165_v56  ;;  %937 = vmatmul.msk.f32.vlgmr.msrb.gmra.mxu3 %vm100_vm1, %v217_v37 }
 0x296   :  { %945 = vmatpush.xpose.msk.msra.mxu3 %vm100_vm1, %v403_v53 }
 0x297   :  { %v170_v61 = vadd.f32 %v1019_v48, %v169_v58 }
 0x299   :  { %v556_v63 = vpop.permute.xlu2 %555  ;;  %v174_v0 = vsel %vm173_vm9, %v1019_v48, %v170_v61 }
 0x29a   :  { %946 = vmatpush.xpose.msk.msra.mxu3 %vm100_vm1, %v401_v60  ;;  %953 = vmatpush.xpose.msk.msra.mxu1 %vm100_vm1, %v556_v63  ;;  %v179_v1 = vsel %vm176_vm10, %v178_v62, %v174_v0 }
 0x29b   :  { %v180_v2 = vmul.f32 %v1015_v33, %v179_v1 }
 0x29d   :  { %934 = vmatmul.msk.f32.gmra.mxu2 %vm132_vm2, %v180_v2  ;;  %938 = vmatmul.msk.f32.gmra.mxu3 %vm100_vm1, %v219_v40 }
 0x29e   :  { %954 = vmatpush.xpose.msk.msra.mxu1 %vm100_vm1, %v554_v3 }
 0x2a1   :  { %v397_v6 = vpop.permute.xlu2 %396 }
 0x2a5   :  { %947 = vmatmul.msk.f32.vlgmr.msra.gmra.mxu3 %vm100_vm1, %v397_v6 }
 0x2a9   :  { %v552_v23 = vpop.permute.xlu2 %551 }
 0x2ad   :  { %948 = vmatmul.msk.f32.gmra.mxu3 %vm100_vm1, %v399_v7 }
 0x318   :  { %v210_v8 = vpop.f32.mrf.mxu2  ;;  %v249_v9 = vpop.f32.mrf.mxu3 }
 0x319   :  { %v250_v10 = vadd.f32 %v249_v9, %v1220_v17  ;;  %943 = vmatmul.msk.f32.vlgmr.msrb.gmra.mxu1 %vm100_vm1, %v210_v8 }
 0x31b   :  { %v255_v12 = vsel %vm132_vm2, %v250_v10, -inf }
 0x31c   :  { %256 = vmax.xlane.f32.xlu1 %v255_v12 }
 0x320   :  { %v213_v13 = vpop.f32.mrf.mxu2  ;;  %v252_v14 = vpop.f32.mrf.mxu3 }
 0x321   :  { %v253_v15 = vadd.f32 %v252_v14, %v1227_v21  ;;  %944 = vmatmul.msk.f32.gmra.mxu1 %vm100_vm1, %v213_v13 }
 0x323   :  { %v258_v16 = vsel %vm132_vm2, %v253_v15, -inf }
 0x324   :  { %259 = vmax.xlane.f32.xlu0 %v258_v16 }
 0x328   :  { %v429_v19 = vpop.f32.mrf.mxu3 }
 0x329   :  { %v430_v20 = vadd.f32 %v429_v19, %v1220_v17  ;;  %955 = vmatmul.msk.f32.vlgmr.msra.gmra.mxu1 %vm100_vm1, %v550_v18 }
 0x32b   :  { %v435_v22 = vsel %vm132_vm2, %v430_v20, -inf }
 0x32c   :  { %436 = vmax.xlane.f32.xlu1 %v435_v22 }
 0x330   :  { %v432_v24 = vpop.f32.mrf.mxu3 }
 0x331   :  { %v433_v25 = vadd.f32 %v432_v24, %v1227_v21  ;;  %956 = vmatmul.msk.f32.gmra.mxu1 %vm100_vm1, %v552_v23 }
 0x333   :  { %v438_v26 = vsel %vm132_vm2, %v433_v25, -inf }
 0x334   :  { %439 = vmax.xlane.f32.xlu0 %v438_v26 }
 0x38f   :  { %v257_v27 = vpop.xlane.xlu1 %256 }
 0x390   :  { %v261_v28 = vsub.f32 %v250_v10, %v257_v27 }
 0x392   :  { %v263_v29 = vmul.f32 1.442695, %v261_v28 }
 0x394   :  { %1020 = vpow2.f32 %v263_v29 }
 0x396   :  { %v1266_v30 = vpop.f32.mrf.mxu1 }
 0x397   :  { %v260_v34 = vpop.xlane.xlu0 %259 }
 0x398   :  { %v262_v41 = vsub.f32 %v253_v15, %v260_v34 }
 0x39a   :  { %v1268_v31 = vpop.eup %1020  ;;  %v265_v47 = vmul.f32 1.442695, %v262_v41 }
 0x39b   :  { %v267_v32 = vsel %vm132_vm2, %v1268_v31, 0.0 }
 0x39c   :  { %268 = vadd.xlane.f32.xlu1 %v267_v32 }
 0x39e   :  { %v1272_v33 = vpop.f32.mrf.mxu1 }
 0x39f   :  { %v437_v35 = vpop.xlane.xlu1 %436 }
 0x3a0   :  { %v441_v36 = vsub.f32 %v430_v20, %v437_v35 }
 0x3a2   :  { %v443_v37 = vmul.f32 1.442695, %v441_v36 }
 0x3a4   :  { %1022 = vpow2.f32 %v443_v37 }
 0x3a6   :  { %v582_v38 = vpop.f32.mrf.mxu1 }
 0x3a7   :  { %v583_v39 = vadd.f32 %v582_v38, %v1220_v17  ;;  %v440_v40 = vpop.xlane.xlu0 %439 }
 0x3a8   :  { %v442_v42 = vsub.f32 %v433_v25, %v440_v40 }
 0x3a9   :  { %v588_v43 = vsel %vm132_vm2, %v583_v39, -inf }
 0x3aa   :  { %v1276_v44 = vpop.eup %1022  ;;  %v445_v45 = vmul.f32 1.442695, %v442_v42  ;;  %589 = vmax.xlane.f32.xlu2 %v588_v43 }
 0x3ab   :  { %v447_v46 = vsel %vm132_vm2, %v1276_v44, 0.0 }
 0x3ac   :  { %1024 = vpow2.f32 %v445_v45  ;;  %448 = vadd.xlane.f32.xlu1 %v447_v46 }
 0x3ad   :  { %1026 = vpow2.f32 %v265_v47 }
 0x3ae   :  { %v585_v48 = vpop.f32.mrf.mxu1 }
 0x3af   :  { %v586_v49 = vadd.f32 %v585_v48, %v1227_v21 }
 0x3b1   :  { %v591_v17 = vsel %vm132_vm2, %v586_v49, -inf }
 0x3b2   :  { %v1282_v50 = vpop.eup %1024  ;;  %592 = vmax.xlane.f32.xlu2 %v591_v17 }
 0x3b3   :  { %v450_v51 = vsel %vm132_vm2, %v1282_v50, 0.0  ;;  %v1286_v52 = vpop.eup %1026 }
 0x3b4   :  { %451 = vadd.xlane.f32.xlu1 %v450_v51  ;;  %v270_v53 = vsel %vm132_vm2, %v1286_v52, 0.0 }
 0x3ba   :  { %271 = vadd.xlane.f32.xlu2 %v270_v53 }
 0x3cd   :  { %1000 = vrot.lane.b32.xlu1 %v1203_v11, %s1088_s21 }
 0x3d2   :  { %990 = vrot.lane.b32.xlu2 %v1203_v11, %s1089_s22 }
 0x40f   :  { %v269_v21 = vpop.xlane.xlu1 %268 }
 0x410   :  { %1028 = vrcp.f32 %v269_v21  ;;  %v284_v10 = vand.u32 2147483648, %v269_v21  ;;  %vm278_vm12 = vweird.f32 %v269_v21  ;;  %v282_v12 = vand.u32 2147483647, %v269_v21 }
 0x412   :  { %v285_v18 = vor.u32 1.1754944e-38, %v284_v10  ;;  %vm283_vm14 = vcmp.eq.f32.partialorder %v282_v12, 8.507059e+37 }
 0x416   :  { %v1029_v56 = vpop.eup %1028 }
 0x417   :  { %v274_v58 = vmul.f32 %v1029_v56, %v269_v21  ;;  %vm279_vm11 = vweird.f32 %v1029_v56 }
 0x418   :  { %vm280_vm13 = vmor %vm278_vm12, %vm279_vm11 }
 0x419   :  { %v275_v62 = vsub.f32 1.0, %v274_v58 }
 0x41b   :  { %v276_v2 = vmul.f32 %v1029_v56, %v275_v62 }
 0x41d   :  { %v590_v54 = vpop.xlane.xlu2 %589  ;;  %v277_v7 = vadd.f32 %v1029_v56, %v276_v2 }
 0x41e   :  { %v594_v55 = vsub.f32 %v583_v39, %v590_v54 }
 0x41f   :  { %v1292_v59 = vpop.xlane.xlu1 %448  ;;  %v281_v15 = vsel %vm280_vm13, %v1029_v56, %v277_v7 }
 0x420   :  { %v596_v57 = vmul.f32 1.442695, %v594_v55  ;;  %v286_v23 = vsel %vm283_vm14, %v285_v18, %v281_v15  ;;  %vm458_vm7 = vweird.f32 %v1292_v59  ;;  %v462_v46 = vand.u32 2147483647, %v1292_v59 }
 0x421   :  { %v287_v32 = vmul.f32 %v1268_v31, %v286_v23  ;;  %v464_v31 = vand.u32 2147483648, %v1292_v59 }
 0x422   :  { %1030 = vpow2.f32 %v596_v57  ;;  %vm463_vm9 = vcmp.eq.f32.partialorder %v462_v46, 8.507059e+37 }
 0x423   :  { %1032 = vrcp.f32 %v1292_v59  ;;  %v465_v51 = vor.u32 1.1754944e-38, %v464_v31 }
 0x425   :  { %v593_v60 = vpop.xlane.xlu2 %592 }
 0x426   :  { %v595_v61 = vsub.f32 %v586_v49, %v593_v60  ;;  %v91_v60 = vld [vmem:[%s1422_s4 + $0x8] sm:$0xff] }
 0x427   :  { %v1299_v8 = vpop.xlane.xlu1 %451  ;;  %359 = vmatpush.msrb.mxu0 %v91_v60 }
 0x428   :  { %v1294_v63 = vpop.eup %1030  ;;  %v598_v0 = vmul.f32 1.442695, %v595_v61  ;;  %v479_v54 = vand.u32 2147483648, %v1299_v8  ;;  %vm473_vm11 = vweird.f32 %v1299_v8  ;;  %v477_v55 = vand.u32 2147483647, %v1299_v8 }
 0x429   :  { %v600_v1 = vsel %vm132_vm2, %v1294_v63, 0.0  ;;  %v1033_v6 = vpop.eup %1032 }
 0x42a   :  { %1034 = vpow2.f32 %v598_v0  ;;  %601 = vadd.xlane.f32.xlu0 %v600_v1  ;;  %v454_v14 = vmul.f32 %v1033_v6, %v1292_v59  ;;  %vm459_vm6 = vweird.f32 %v1033_v6  ;;  %v480_v57 = vor.u32 1.1754944e-38, %v479_v54 }
 0x42b   :  { %vm460_vm8 = vmor %vm458_vm7, %vm459_vm6  ;;  %vm478_vm13 = vcmp.eq.f32.partialorder %v477_v55, 8.507059e+37 }
 0x42c   :  { %v455_v24 = vsub.f32 1.0, %v454_v14 }
 0x42d   :  { %v272_v3 = vpop.xlane.xlu2 %271 }
 0x42e   :  { %1036 = vrcp.f32 %v272_v3  ;;  %v299_v27 = vand.u32 2147483648, %v272_v3  ;;  %v297_v34 = vand.u32 2147483647, %v272_v3  ;;  %v456_v35 = vmul.f32 %v1033_v6, %v455_v24 }
 0x42f   :  { %1038 = vrcp.f32 %v1299_v8  ;;  %vm293_vm3 = vweird.f32 %v272_v3 }
 0x430   :  { %v1301_v9 = vpop.eup %1034  ;;  %v300_v38 = vor.u32 1.1754944e-38, %v299_v27  ;;  %vm298_vm5 = vcmp.eq.f32.partialorder %v297_v34, 8.507059e+37  ;;  %v457_v41 = vadd.f32 %v1033_v6, %v456_v35  ;;  %v93_v35 = vld [vmem:[%s1422_s4 + $0x18] sm:$0xff] }
 0x431   :  { %v603_v13 = vsel %vm132_vm2, %v1301_v9, 0.0 }
 0x432   :  { %604 = vadd.xlane.f32.xlu0 %v603_v13  ;;  %v461_v49 = vsel %vm460_vm8, %v1033_v6, %v457_v41 }
 0x433   :  { %v466_v53 = vsel %vm463_vm9, %v465_v51, %v461_v49 }
 0x434   :  { %v1037_v16 = vpop.eup %1036 }
 0x435   :  { %v289_v19 = vmul.f32 %v1037_v16, %v272_v3  ;;  %v991_v20 = vpop.permute.xlu2 %990  ;;  %v1039_v26 = vpop.eup %1038  ;;  %vm294_vm15 = vweird.f32 %v1037_v16 }
 0x436   :  { %v992_v22 = vunpack.i.l.bf16 %v991_v20  ;;  %v993_v28 = vunpack.i.h.bf16 %v991_v20  ;;  %v469_v36 = vmul.f32 %v1039_v26, %v1299_v8  ;;  %vm295_vm4 = vmor %vm293_vm3, %vm294_vm15  ;;  %vm474_vm10 = vweird.f32 %v1039_v26 }
 0x437   :  { %v290_v25 = vsub.f32 1.0, %v289_v19  ;;  %vm475_vm12 = vmor %vm473_vm11, %vm474_vm10 }
 0x438   :  { %329 = vmatpush.msrb.mxu2 %v992_v22  ;;  %v470_v42 = vsub.f32 1.0, %v469_v36 }
 0x439   :  { %v291_v29 = vmul.f32 %v1037_v16, %v290_v25 }
 0x43a   :  { %330 = vmatpush.msrb.mxu2 %v993_v28  ;;  %v471_v17 = vmul.f32 %v1039_v26, %v470_v42  ;;  %v1005_v42 = vld [vmem:[%s1423_s5] ss:$0 sm:$0xff] }
 0x43b   :  { %939 = vmatmul.msk.f32.vlgmr.msrb.gmra.mxu2 %vm132_vm2, %v287_v32  ;;  %v292_v37 = vadd.f32 %v1037_v16, %v291_v29 }
 0x43c   :  { %v472_v21 = vadd.f32 %v1039_v26, %v471_v17 }
 0x43d   :  { %v296_v39 = vsel %vm295_vm4, %v1037_v16, %v292_v37 }
 0x43e   :  { %v301_v40 = vsel %vm298_vm5, %v300_v38, %v296_v39  ;;  %v476_v56 = vsel %vm475_vm12, %v1039_v26, %v472_v21 }
 0x43f   :  { %v1001_v43 = vpop.permute.xlu1 %1000  ;;  %v302_v47 = vmul.f32 %v1286_v52, %v301_v40  ;;  %v467_v52 = vmul.f32 %v1276_v44, %v466_v53  ;;  %v481_v58 = vsel %vm478_vm13, %v480_v57, %v476_v56 }
 0x440   :  { %v1002_v45 = vunpack.i.l.bf16 %v1001_v43  ;;  %v1003_v48 = vunpack.i.h.bf16 %v1001_v43  ;;  %v482_v59 = vmul.f32 %v1282_v50, %v481_v58  ;;  %v92_v50 = vld [vmem:[%s1422_s4 + $0x10] sm:$0xff] }
 0x441   :  { %539 = vmatpush.msra.mxu0 %v92_v50  ;;  %v775_v50 = vld [vmem:[%s1426_s8 + $0x10] sm:$0xff] }
 0x442   :  { %509 = vmatpush.msra.mxu2 %v1002_v45 }
 0x443   :  { %940 = vmatmul.msk.f32.gmra.mxu2 %vm132_vm2, %v302_v47 }
 0x444   :  { %510 = vmatpush.msra.mxu2 %v1003_v48 }
 0x446   :  { %995 = vrot.lane.b32.xlu0 %v1203_v11, %s1090_s23  ;;  %692 = vmatpush.msrb.mxu2 %v93_v35 }
 0x44b   :  { %949 = vmatmul.msk.f32.vlgmr.msra.gmra.mxu2 %vm132_vm2, %v467_v52  ;;  %v1091_v52 = vmov 32.0  }
 0x453   :  { %950 = vmatmul.msk.f32.gmra.mxu2 %vm132_vm2, %v482_v59 }
 0x49d   :  { %v602_v11 = vpop.xlane.xlu0 %601 }
 0x49e   :  { %1040 = vrcp.f32 %v602_v11  ;;  %v617_v8 = vand.u32 2147483648, %v602_v11  ;;  %vm611_vm15 = vweird.f32 %v602_v11  ;;  %v615_v10 = vand.u32 2147483647, %v602_v11 }
 0x4a0   :  { %v618_v14 = vor.u32 1.1754944e-38, %v617_v8  ;;  %vm616_vm4 = vcmp.eq.f32.partialorder %v615_v10, 8.507059e+37 }
 0x4a4   :  { %v1041_v44 = vpop.eup %1040 }
 0x4a5   :  { %v605_v61 = vpop.xlane.xlu0 %604  ;;  %v607_v62 = vmul.f32 %v1041_v44, %v602_v11  ;;  %vm612_vm14 = vweird.f32 %v1041_v44 }
 0x4a6   :  { %1042 = vrcp.f32 %v605_v61  ;;  %vm613_vm3 = vmor %vm611_vm15, %vm612_vm14  ;;  %v632_v20 = vand.u32 2147483648, %v605_v61  ;;  %vm626_vm6 = vweird.f32 %v605_v61  ;;  %v630_v24 = vand.u32 2147483647, %v605_v61 }
 0x4a7   :  { %v608_v0 = vsub.f32 1.0, %v607_v62  ;;  %1044 = vrcp.f32 %v1091_v52 }
 0x4a8   :  { %v633_v27 = vor.u32 1.1754944e-38, %v632_v20  ;;  %vm631_vm8 = vcmp.eq.f32.partialorder %v630_v24, 8.507059e+37 }
 0x4a9   :  { %v609_v2 = vmul.f32 %v1041_v44, %v608_v0 }
 0x4ab   :  { %v610_v6 = vadd.f32 %v1041_v44, %v609_v2 }
 0x4ac   :  { %v1043_v1 = vpop.eup %1042 }
 0x4ad   :  { %v622_v3 = vmul.f32 %v1043_v1, %v605_v61  ;;  %v614_v12 = vsel %vm613_vm3, %v1041_v44, %v610_v6  ;;  %vm627_vm5 = vweird.f32 %v1043_v1  ;;  %v1045_v55 = vpop.eup %1044  ;;  %v774_v6 = vld [vmem:[%s1426_s8 + $0x8] sm:$0xff] }
 0x4ae   :  { %v619_v16 = vsel %vm616_vm4, %v618_v14, %v614_v12  ;;  %vm628_vm7 = vmor %vm626_vm6, %vm627_vm5  ;;  %v719_v56 = vmul.f32 32.0, %v1045_v55 }
 0x4af   :  { %v623_v7 = vsub.f32 1.0, %v622_v3  ;;  %v620_v23 = vmul.f32 %v1294_v63, %v619_v16  ;;  %v776_v3 = vld [vmem:[%s1426_s8 + $0x18] sm:$0xff] }
 0x4b0   :  { %v720_v57 = vsub.f32 1.0, %v719_v56 }
 0x4b1   :  { %v624_v13 = vmul.f32 %v1043_v1, %v623_v7  ;;  %v773_v7 = vld [vmem:[%s1426_s8] sm:$0xff] }
 0x4b3   :  { %v625_v19 = vadd.f32 %v1043_v1, %v624_v13  ;;  %v815_v13 = vld [vmem:[%s1428_s10 + $0x18] sm:$0xff] }
 0x4b4   :  { %838 = vmatpush.msrb.mxu1 %v815_v13 }
 0x4b5   :  { %v629_v26 = vsel %vm628_vm7, %v1043_v1, %v625_v19 }
 0x4b6   :  { %v634_v28 = vsel %vm631_vm8, %v633_v27, %v629_v26  ;;  %v1006_v27 = vld [vmem:[%s1424_s6] ss:$0 sm:$0xff] }
 0x4b7   :  { %v635_v29 = vmul.f32 %v1301_v9, %v634_v28 }
 0x4b8   :  { %v996_v15 = vpop.permute.xlu0 %995 }
 0x4b9   :  { %v997_v18 = vunpack.i.l.bf16 %v996_v15  ;;  %v998_v22 = vunpack.i.h.bf16 %v996_v15 }
 0x4bb   :  { %662 = vmatpush.msrb.mxu3 %v997_v18 }
 0x4bd   :  { %663 = vmatpush.msrb.mxu3 %v998_v22 }
 0x4be   :  { %v332_v25 = vpop.f32.mrf.mxu2  ;;  %957 = vmatmul.msk.f32.vlgmr.msrb.gmra.mxu3 %vm132_vm2, %v620_v23 }
 0x4bf   :  { %941 = vmatmul.msk.f32.vlgmr.msrb.gmra.mxu0 %vm100_vm1, %v332_v25 }
 0x4c0   :  { %799 = vmatpush.msrb.mxu0 %v776_v3 }
 0x4c2   :  { %800 = vmatpush.msrb.mxu0 %v775_v50 }
 0x4c4   :  { %801 = vmatpush.msrb.mxu0 %v774_v6 }
 0x4c6   :  { %v335_v32 = vpop.f32.mrf.mxu2  ;;  %958 = vmatmul.msk.f32.gmra.mxu3 %vm132_vm2, %v635_v29  ;;  %802 = vmatpush.msrb.mxu0 %v773_v7 }
 0x4c7   :  { %942 = vmatmul.msk.f32.gmra.mxu0 %vm100_vm1, %v335_v32 }
 0x4ce   :  { %v512_v63 = vpop.f32.mrf.mxu2 }
 0x4cf   :  { %951 = vmatmul.msk.f32.vlgmr.msra.gmra.mxu0 %vm100_vm1, %v512_v63  ;;  %v1007_v63 = vld [vmem:[%s1425_s7] ss:$0 sm:$0xff] }
 0x4d6   :  { %v515_v34 = vpop.f32.mrf.mxu2 }
 0x4d7   :  { %952 = vmatmul.msk.f32.gmra.mxu0 %vm100_vm1, %v515_v34 }
 0x53c   :  { %v361_v37 = vpop.f32.mrf.mxu0 }
 0x53d   :  { %v391_v40 = vadd.f32 %v1266_v30, %v361_v37 }
 0x541   :  { %v665_v36 = vpop.f32.mrf.mxu3 }
 0x542   :  { %959 = vmatmul.msk.f32.vlgmr.msrb.gmra.mxu2 %vm100_vm1, %v665_v36 }
 0x544   :  { %v364_v38 = vpop.f32.mrf.mxu0 }
 0x545   :  { %v394_v47 = vadd.f32 %v1272_v33, %v364_v38  ;;  %v721_v33 = vmul.f32 %v1045_v55, %v720_v57 }
 0x547   :  { %v722_v58 = vadd.f32 %v1045_v55, %v721_v33 }
 0x549   :  { %v668_v9 = vpop.f32.mrf.mxu3 }
 0x54a   :  { %960 = vmatmul.msk.f32.gmra.mxu2 %vm100_vm1, %v668_v9  ;;  %vm723_vm1 = vweird.f32 %v1045_v55 }
 0x54c   :  { %v541_v39 = vpop.f32.mrf.mxu0 }
 0x54d   :  { %v547_v41 = vadd.f32 %v541_v39, %v391_v40 }
 0x554   :  { %v544_v46 = vpop.f32.mrf.mxu0 }
 0x555   :  { %v548_v49 = vadd.f32 %v544_v46, %v394_v47 }
 0x5c5   :  { %v694_v43 = vpop.f32.mrf.mxu2 }
 0x5c6   :  { %v700_v31 = vadd.f32 %v694_v43, %v547_v41  ;;  %v813_v43 = vld [vmem:[%s1428_s10 + $0x8] sm:$0xff] }
 0x5c8   :  { %v706_v45 = vadd.f32 %v1005_v42, %v700_v31  ;;  %v812_v31 = vld [vmem:[%s1428_s10] sm:$0xff] }
 0x5ca   :  { %v708_v48 = vadd.f32 %v706_v45, %v1190_v5  ;;  %v1351_v5 = vsel %vm723_vm1, %v1045_v55, %v722_v58  ;;  %v1008_v45 = vld [vmem:[%s1427_s9] ss:$0 sm:$0xff] }
 0x5cc   :  { %v712_v17 = vsel %vm58_vm0, %v708_v48, 0.0 }
 0x5cd   :  { %v697_v51 = vpop.f32.mrf.mxu2  ;;  %713 = vadd.xlane.f32.xlu2 %v712_v17 }
 0x5ce   :  { %v701_v53 = vadd.f32 %v697_v51, %v548_v49 }
 0x5d0   :  { %v707_v30 = vadd.f32 %v1005_v42, %v701_v53  ;;  %v814_v42 = vld [vmem:[%s1428_s10 + $0x10] sm:$0xff]  ;;  %v1009_v53 = vld [vmem:[%s1429_s11] ss:$0 sm:$0xff] }
 0x5d1   :  { %839 = vmatpush.msrb.mxu1 %v814_v42 }
 0x5d2   :  { %v709_v21 = vadd.f32 %v707_v30, %v1185_v4 }
 0x5d3   :  { %840 = vmatpush.msrb.mxu1 %v813_v43 }
 0x5d4   :  { %v715_v54 = vsel %vm58_vm0, %v709_v21, 0.0 }
 0x5d5   :  { %716 = vadd.xlane.f32.xlu0 %v715_v54  ;;  %841 = vmatpush.msrb.mxu1 %v812_v31 }
 0x640   :  { %v714_v59 = vpop.xlane.xlu2 %713 }
 0x641   :  { %v725_v11 = vmul.f32 %v1351_v5, %v714_v59 }
 0x643   :  { %v727_v60 = vsub.f32 %v708_v48, %v725_v11 }
 0x645   :  { %v729_v44 = vmul.f32 %v727_v60, %v727_v60 }
 0x647   :  { %v731_v4 = vsel %vm58_vm0, %v729_v44, 0.0 }
 0x648   :  { %732 = vadd.xlane.f32.xlu1 %v731_v4  ;;  %v717_v61 = vpop.xlane.xlu0 %716 }
 0x649   :  { %v726_v62 = vmul.f32 %v1351_v5, %v717_v61 }
 0x64b   :  { %v728_v0 = vsub.f32 %v709_v21, %v726_v62 }
 0x64d   :  { %v730_v1 = vmul.f32 %v728_v0, %v728_v0 }
 0x64f   :  { %v734_v2 = vsel %vm58_vm0, %v730_v1, 0.0 }
 0x650   :  { %735 = vadd.xlane.f32.xlu2 %v734_v2 }
 0x6bb   :  { %v733_v8 = vpop.xlane.xlu1 %732 }
 0x6bc   :  { %v737_v10 = vmul.f32 %v733_v8, %v1351_v5 }
 0x6be   :  { %v739_v12 = vadd.f32 1e-05, %v737_v10 }
 0x6c0   :  { %1046 = vrsqrt.f32 %v739_v12  ;;  %vm747_vm9 = vweird.f32 %v739_v12 }
 0x6c3   :  { %v736_v14 = vpop.xlane.xlu2 %735 }
 0x6c4   :  { %v738_v15 = vmul.f32 %v736_v14, %v1351_v5 }
 0x6c6   :  { %v1047_v16 = vpop.eup %1046  ;;  %v740_v18 = vadd.f32 1e-05, %v738_v15 }
 0x6c7   :  { %v742_v19 = vmul.f32 %v1047_v16, %v739_v12  ;;  %vm748_vm2 = vweird.f32 %v1047_v16 }
 0x6c8   :  { %1048 = vrsqrt.f32 %v740_v18  ;;  %vm749_vm10 = vmor %vm747_vm9, %vm748_vm2  ;;  %vm757_vm12 = vweird.f32 %v740_v18 }
 0x6c9   :  { %v743_v20 = vmul.f32 %v1047_v16, %v742_v19 }
 0x6cb   :  { %v744_v22 = vmul.f32 0.5, %v743_v20  ;;  %v1010_v20 = vld [vmem:[%s1430_s12] ss:$0 sm:$0xff]  ;;  %s1092_s12 = smov [#allocation2]  }
 0x6cc   :  { %s913_s4 = sshll.u32 %s1092_s12, 4  ;;  %s914_s4 = int_to_ptr.vmem [resolvable:$true] %s913_s4 }
 0x6cd   :  { %v745_v23 = vsub.f32 1.5, %v744_v22 }
 0x6ce   :  { %v1049_v24 = vpop.eup %1048 }
 0x6cf   :  { %v746_v25 = vmul.f32 %v1047_v16, %v745_v23  ;;  %v752_v26 = vmul.f32 %v1049_v24, %v740_v18  ;;  %vm758_vm11 = vweird.f32 %v1049_v24 }
 0x6d0   :  { %vm759_vm13 = vmor %vm757_vm12, %vm758_vm11 }
 0x6d1   :  { %v750_v28 = vsel %vm749_vm10, %v1047_v16, %v746_v25  ;;  %v753_v29 = vmul.f32 %v1049_v24, %v752_v26 }
 0x6d2   :  { %v761_v32 = vmul.f32 %v750_v28, %v727_v60 }
 0x6d3   :  { %v754_v34 = vmul.f32 0.5, %v753_v29 }
 0x6d4   :  { %v766_v35 = vmul.f32 %v1006_v27, %v761_v32 }
 0x6d5   :  { %v755_v36 = vsub.f32 1.5, %v754_v34 }
 0x6d6   :  { %v771_v9 = vadd.f32 %v1007_v63, %v766_v35 }
 0x6d7   :  { %v756_v37 = vmul.f32 %v1049_v24, %v755_v36 }
 0x6d8   :  { %961 = vmatmul.msk.f32.vlgmr.msrb.gmra.mxu0 %vm58_vm0, %v771_v9 }
 0x6d9   :  { %v760_v38 = vsel %vm759_vm13, %v1049_v24, %v756_v37  ;;  %v1011_v24 = vld [vmem:[%s1431_s13] ss:$0 sm:$0xff]  ;;  %s1093_s13 = smov 128  }
 0x6da   :  { %v762_v39 = vmul.f32 %v760_v38, %v728_v0 }
 0x6dc   :  { %v767_v40 = vmul.f32 %v1006_v27, %v762_v39 }
 0x6de   :  { %v772_v41 = vadd.f32 %v1007_v63, %v767_v40 }
 0x6e0   :  { %962 = vmatmul.msk.f32.gmra.mxu0 %vm58_vm0, %v772_v41 }
 0x755   :  { %v804_v46 = vpop.f32.mrf.mxu0 }
 0x756   :  { %v805_v47 = vadd.f32 %v1008_v45, %v804_v46 }
 0x758   :  { %v810_v48 = vmax.f32 %v805_v47, 0.0 }
 0x75a   :  { %963 = vmatmul.msk.f32.vlgmr.msrb.gmra.mxu1 %vm58_vm0, %v810_v48 }
 0x75d   :  { %v807_v49 = vpop.f32.mrf.mxu0 }
 0x75e   :  { %v808_v17 = vadd.f32 %v1008_v45, %v807_v49 }
 0x760   :  { %v811_v51 = vmax.f32 %v808_v17, 0.0 }
 0x762   :  { %964 = vmatmul.msk.f32.gmra.mxu1 %vm58_vm0, %v811_v51 }
 0x7d7   :  { %v843_v30 = vpop.f32.mrf.mxu1 }
 0x7d8   :  { %v844_v21 = vadd.f32 %v1009_v53, %v843_v30 }
 0x7da   :  { %v849_v54 = vadd.f32 %v844_v21, %v805_v47 }
 0x7dc   :  { %v853_v52 = vsel %vm58_vm0, %v849_v54, 0.0 }
 0x7dd   :  { %854 = vadd.xlane.f32.xlu0 %v853_v52 }
 0x7df   :  { %v846_v55 = vpop.f32.mrf.mxu1 }
 0x7e0   :  { %v847_v56 = vadd.f32 %v1009_v53, %v846_v55 }
 0x7e2   :  { %v850_v57 = vadd.f32 %v847_v56, %v808_v17 }
 0x7e4   :  { %v856_v33 = vsel %vm58_vm0, %v850_v57, 0.0 }
 0x7e5   :  { %857 = vadd.xlane.f32.xlu2 %v856_v33 }
 0x850   :  { %v855_v58 = vpop.xlane.xlu0 %854 }
 0x851   :  { %v859_v59 = vmul.f32 %v855_v58, %v1351_v5 }
 0x853   :  { %v861_v11 = vsub.f32 %v849_v54, %v859_v59 }
 0x855   :  { %v863_v60 = vmul.f32 %v861_v11, %v861_v11 }
 0x857   :  { %v865_v44 = vsel %vm58_vm0, %v863_v60, 0.0 }
 0x858   :  { %v858_v4 = vpop.xlane.xlu2 %857  ;;  %866 = vadd.xlane.f32.xlu1 %v865_v44 }
 0x859   :  { %v860_v61 = vmul.f32 %v858_v4, %v1351_v5 }
 0x85b   :  { %v862_v62 = vsub.f32 %v850_v57, %v860_v61 }
 0x85d   :  { %v864_v0 = vmul.f32 %v862_v62, %v862_v62 }
 0x85f   :  { %v868_v1 = vsel %vm58_vm0, %v864_v0, 0.0 }
 0x860   :  { %869 = vadd.xlane.f32.xlu0 %v868_v1 }
 0x8cb   :  { %v867_v2 = vpop.xlane.xlu1 %866 }
 0x8cc   :  { %v871_v3 = vmul.f32 %v867_v2, %v1351_v5 }
 0x8ce   :  { %v873_v50 = vadd.f32 1e-05, %v871_v3 }
 0x8d0   :  { %1050 = vrsqrt.f32 %v873_v50  ;;  %vm881_vm15 = vweird.f32 %v873_v50 }
 0x8d3   :  { %v870_v6 = vpop.xlane.xlu0 %869 }
 0x8d4   :  { %v872_v7 = vmul.f32 %v870_v6, %v1351_v5 }
 0x8d6   :  { %v1051_v8 = vpop.eup %1050  ;;  %v874_v10 = vadd.f32 1e-05, %v872_v7 }
 0x8d7   :  { %v876_v12 = vmul.f32 %v1051_v8, %v873_v50  ;;  %vm882_vm14 = vweird.f32 %v1051_v8 }
 0x8d8   :  { %1052 = vrsqrt.f32 %v874_v10  ;;  %vm883_vm3 = vmor %vm881_vm15, %vm882_vm14  ;;  %vm891_vm5 = vweird.f32 %v874_v10 }
 0x8d9   :  { %v877_v13 = vmul.f32 %v1051_v8, %v876_v12 }
 0x8db   :  { %v878_v14 = vmul.f32 0.5, %v877_v13 }
 0x8dd   :  { %v879_v15 = vsub.f32 1.5, %v878_v14 }
 0x8de   :  { %v1053_v16 = vpop.eup %1052 }
 0x8df   :  { %v880_v18 = vmul.f32 %v1051_v8, %v879_v15  ;;  %v886_v19 = vmul.f32 %v1053_v16, %v874_v10  ;;  %vm892_vm4 = vweird.f32 %v1053_v16 }
 0x8e0   :  { %vm893_vm6 = vmor %vm891_vm5, %vm892_vm4 }
 0x8e1   :  { %v884_v22 = vsel %vm883_vm3, %v1051_v8, %v880_v18  ;;  %v887_v23 = vmul.f32 %v1053_v16, %v886_v19 }
 0x8e2   :  { %v895_v5 = vmul.f32 %v884_v22, %v861_v11 }
 0x8e3   :  { %v888_v25 = vmul.f32 0.5, %v887_v23 }
 0x8e4   :  { %v900_v26 = vmul.f32 %v1010_v20, %v895_v5 }
 0x8e5   :  { %v889_v27 = vsub.f32 1.5, %v888_v25 }
 0x8e6   :  { %v905_v28 = vadd.f32 %v1011_v24, %v900_v26 }
 0x8e7   :  { %v890_v29 = vmul.f32 %v1053_v16, %v889_v27 }
 0x8e8   :  { %907 = vst.msk [vmem:[#allocation2] sm:$0xff] %vm58_vm0, %v905_v28 }
 0x8e9   :  { %v894_v32 = vsel %vm893_vm6, %v1053_v16, %v890_v29 }
 0x8ea   :  { %v896_v63 = vmul.f32 %v894_v32, %v862_v62 }
 0x8ec   :  { %v901_v34 = vmul.f32 %v1010_v20, %v896_v63 }
 0x8ee   :  { %v906_v35 = vadd.f32 %v1011_v24, %v901_v34 }
 0x8f0   :  { %908 = vst.msk [vmem:[#allocation2 + $0x8] sm:$0xff] %vm58_vm0, %v906_v35 }
 0x8f1   :  { %921 = dma.vmem_to_hbm [thread:$0]  %s914_s4, 256, %s916_s30, [#allocation3], %s1093_s13, %s1093_s13, %s1094_s15  }
 0x8f2   :  { %1078 = dma.done.wait [#allocation3], 256  }
 0x8f3   :  { %1079 = vsyncadd [#allocation3], 4294967040 }
 0x8f4   :  { %926 = vsyncpa [#allocation3], 1 }

</bundles_post_ra>
